<compile_context>
chip_gen: v7x
topology: tpu7x:2x2x1
jax: 0.10.0
libtpu: 0.0.40
codegen_flags: <defaults>
</compile_context>

<pallas_src>
import functools

import jax
import jax.numpy as jnp
from jax.experimental import pallas as pl
from jax.experimental.pallas import tpu as pltpu

_LANE = 128
_BN_EPS = 1e-5
_NORM_EPS_SQ = 1e-24          # F.normalize eps=1e-12, applied to the sum of squares


def _round_up(x, m):
    return ((x + m - 1) // m) * m


def _pad_2d(a, shape):
    pads = [(0, t - s) for s, t in zip(a.shape, shape)]
    if all(p == (0, 0) for p in pads):
        return a
    return jnp.pad(a, pads)


def _resident(block_shape, index_map):
    """Constant-across-grid block: request single buffering (saves VMEM)."""
    try:
        return pl.BlockSpec(block_shape, index_map,
                            pipeline_mode=pl.Buffered(buffer_count=1))
    except Exception:  # older API without pipeline_mode
        return pl.BlockSpec(block_shape, index_map)


def _vmem_limit_bytes():
    cap = 64 * 1024 * 1024          # conservative default (v7x per-TC VMEM)
    try:
        cap = int(pltpu.get_tpu_info().vmem_capacity_bytes)
    except Exception:
        pass
    # ~100 MiB on 128 MiB parts (v5e/v6e), ~50 MiB on 64 MiB parts (v7x).
    return min(int(cap * 0.78), 100 * 1024 * 1024)


def _pick_tile_m(n8, din_p, h_p, dout_p, p_p, mxu_bytes, h_bytes, out_bytes,
                 vmem_limit):
    """Largest batch tile whose double-buffered streaming + single-buffered
    resident weights fit the per-generation VMEM budget."""
    budget = int(vmem_limit * 0.85)
    resident1 = din_p * h_p * mxu_bytes + 16 * h_p * 4
    resident2 = (h_p * dout_p + dout_p * p_p) * mxu_bytes + (2 * h_p + dout_p) * 4
    tm = 8
    for cand in (1024, 768, 512, 384, 256, 192, 128, 96, 64, 32, 16, 8):
        if cand > n8:
            continue
        stream1 = 2 * cand * (din_p * mxu_bytes + h_p * h_bytes)
        stream2 = 2 * cand * (h_p * h_bytes + (dout_p + p_p) * out_bytes)
        if resident1 + stream1 <= budget and resident2 + stream2 <= budget:
            tm = cand
            break
    # Keep >= 2 batch tiles when the batch allows it so both TensorCores get
    # work on v7x (pass-1 core split and pass-2 "parallel" grid).
    if n8 >= 16:
        tm = min(tm, _round_up(-(-n8 // 2), 8))
    return max(tm, 8)


# --------------------------------------------------------------------------- #
# Pass 1: first linear + per-core partial BatchNorm statistics
# --------------------------------------------------------------------------- #
def _stats_kernel(x_ref, w1_ref, b1_ref, h_ref, sum_ref, sumsq_ref,
                  *, n_valid, tile_m, tiles_per_core, has_pad):
    i = pl.program_id(1)

    @pl.when(i == 0)
    def _init():
        sum_ref[...] = jnp.zeros_like(sum_ref)
        sumsq_ref[...] = jnp.zeros_like(sumsq_ref)

    # Linear 1 on this batch tile: [TM, Din_p] @ [Din_p, H_p] + [1, H_p], f32 acc.
    h = jnp.dot(x_ref[...], w1_ref[...],
                preferred_element_type=jnp.float32) + b1_ref[...]
    # Cross-pass staging in mxu_dtype (bf16 -> half the HBM traffic); statistics
    # below are accumulated from the f32 value.
    h_ref[...] = h.astype(h_ref.dtype)

    def _acc(hv):
        sum_ref[...] += jnp.sum(hv, axis=0, keepdims=True)        # running sum
        sumsq_ref[...] += jnp.sum(hv * hv, axis=0, keepdims=True)  # running sumsq

    if has_pad:
        c = pl.program_id(0)
        row0 = (c * tiles_per_core + i) * tile_m
        needs_mask = row0 + tile_m > n_valid

        @pl.when(needs_mask)
        def _masked():  # only tiles containing padded batch rows pay for the mask
            rows = jax.lax.broadcasted_iota(jnp.int32, (tile_m, 1), 0) + row0
            _acc(jnp.where(rows < n_valid, h, 0.0))

        @pl.when(jnp.logical_not(needs_mask))
        def _full():
            _acc(h)
    else:
        _acc(h)


# --------------------------------------------------------------------------- #
# Pass 2: BN-apply + ReLU + second linear + L2-normalize + prototype logits
# --------------------------------------------------------------------------- #
def _apply_kernel(h_ref, scale_ref, shift_ref, w2_ref, b2_ref, wptn_ref,
                  z_ref, logits_ref, *, mxu_dtype):
    # BatchNorm apply + ReLU in f32.
    h = jnp.maximum(
        h_ref[...].astype(jnp.float32) * scale_ref[...] + shift_ref[...], 0.0)

    # Linear 2: [TM, H_p] @ [H_p, Dout_p] + [1, Dout_p]
    z = jnp.dot(h.astype(mxu_dtype), w2_ref[...],
                preferred_element_type=jnp.float32) + b2_ref[...]

    # L2-normalize along the feature dim (padded cols are zero -> same norm).
    zn = z * jax.lax.rsqrt(
        jnp.maximum(jnp.sum(z * z, axis=-1, keepdims=True), _NORM_EPS_SQ))

    # Prototype logits against pre-normalized, pre-transposed prototypes.
    logits = jnp.dot(zn.astype(mxu_dtype), wptn_ref[...],
                     preferred_element_type=jnp.float32)

    z_ref[...] = zn.astype(z_ref.dtype)
    logits_ref[...] = logits.astype(logits_ref.dtype)


# --------------------------------------------------------------------------- #
# Wrapper
# --------------------------------------------------------------------------- #
def swav_neck(x, w1, b1, w2, b2, wp, *, tile_m=None,
              mxu_dtype=jnp.bfloat16, out_dtype=jnp.float32):
    """SwAV neck forward.

    x:  [N, Din]     w1: [Din, H]    b1: [H]     (torch Linear weights pre-
    w2: [H, Dout]    b2: [Dout]      wp: [P, Dout]  transposed to [in, out])
    Returns (z, logits) == SwAVNeck.forward(x) with normalize=True.
    mxu_dtype: jnp.bfloat16 (fast path) or jnp.float32 (exact).
    out_dtype: dtype of the returned z / logits (bf16 halves writeback if the
               downstream Sinkhorn tolerates it).
    """
    n, din = x.shape
    hdim = w1.shape[1]
    dout = w2.shape[1]
    p = wp.shape[0]
    f32 = jnp.float32

    din_p = _round_up(din, _LANE)
    h_p = _round_up(hdim, _LANE)
    dout_p = _round_up(dout, _LANE)
    p_p = _round_up(p, _LANE)

    mxu_bytes = jnp.dtype(mxu_dtype).itemsize
    h_dtype = mxu_dtype                       # bf16 staging unless exact path
    h_bytes = jnp.dtype(h_dtype).itemsize
    out_bytes = jnp.dtype(out_dtype).itemsize

    vmem_limit = _vmem_limit_bytes()
    n8 = _round_up(n, 8)
    if tile_m is None:
        tm = _pick_tile_m(n8, din_p, h_p, dout_p, p_p,
                          mxu_bytes, h_bytes, out_bytes, vmem_limit)
    else:
        tm = min(_round_up(tile_m, 8), n8)

    n_tiles_min = -(-n8 // tm)
    n_cores = 2 if n_tiles_min >= 2 else 1    # pass-1 core split (v7x megacore)
    tiles_per_core = -(-n_tiles_min // n_cores)
    n_tiles = n_cores * tiles_per_core
    n_pad = n_tiles * tm
    has_pad = n_pad != n

    x_p = _pad_2d(x.astype(f32), (n_pad, din_p)).astype(mxu_dtype)
    w1_p = _pad_2d(w1.astype(f32), (din_p, h_p)).astype(mxu_dtype)
    b1_p = _pad_2d(b1.astype(f32).reshape(1, -1), (1, h_p))
    w2_p = _pad_2d(w2.astype(f32), (h_p, dout_p)).astype(mxu_dtype)
    b2_p = _pad_2d(b2.astype(f32).reshape(1, -1), (1, dout_p))

    # One-time prototype row L2-normalization + transpose (tiny plain-XLA op;
    # keeping it out of pass 1 saves resident VMEM and the cold first step).
    wp32 = wp.astype(f32)
    wpn = wp32 * jax.lax.rsqrt(
        jnp.maximum(jnp.sum(wp32 * wp32, axis=1, keepdims=True), _NORM_EPS_SQ))
    wptn = _pad_2d(wpn.T, (dout_p, p_p)).astype(mxu_dtype)   # [Dout_p, P_p]

    # ---------------- pass 1: linear1 + partial BN stats ----------------
    cost1 = pl.CostEstimate(
        flops=2 * n_pad * din_p * h_p + 4 * n_pad * h_p,
        transcendentals=0,
        bytes_accessed=(x_p.size * x_p.dtype.itemsize
                        + w1_p.size * w1_p.dtype.itemsize
                        + n_pad * h_p * h_bytes
                        + 4 * (2 * n_cores + 1) * h_p),
    )
    h_hbm, psum, psumsq = pl.pallas_call(
        functools.partial(_stats_kernel, n_valid=n, tile_m=tm,
                          tiles_per_core=tiles_per_core, has_pad=has_pad),
        out_shape=(
            jax.ShapeDtypeStruct((n_pad, h_p), h_dtype),       # h (staged)
            jax.ShapeDtypeStruct((n_cores, h_p), f32),         # per-core sum
            jax.ShapeDtypeStruct((n_cores, h_p), f32),         # per-core sumsq
        ),
        grid_spec=pltpu.PrefetchScalarGridSpec(
            num_scalar_prefetch=0,
            grid=(n_cores, tiles_per_core),
            in_specs=[
                pl.BlockSpec((tm, din_p),
                             lambda c, i: (c * tiles_per_core + i, 0)),   # x
                _resident((din_p, h_p), lambda c, i: (0, 0)),             # w1
                _resident((1, h_p), lambda c, i: (0, 0)),                 # b1
            ],
            out_specs=(
                pl.BlockSpec((tm, h_p),
                             lambda c, i: (c * tiles_per_core + i, 0)),   # h
                pl.BlockSpec((1, h_p), lambda c, i: (c, 0)),   # resident per core
                pl.BlockSpec((1, h_p), lambda c, i: (c, 0)),   # resident per core
            ),
        ),
        compiler_params=pltpu.CompilerParams(
            # Core axis parallel (v7x), batch-accumulation axis arbitrary.
            dimension_semantics=("parallel", "arbitrary"),
            vmem_limit_bytes=vmem_limit),
        cost_estimate=cost1,
    )(x_p, w1_p, b1_p)

    # Combine per-core partials -> BN scale / shift (tiny XLA op).
    ssum = jnp.sum(psum, axis=0, keepdims=True)
    ssq = jnp.sum(psumsq, axis=0, keepdims=True)
    mean = ssum / jnp.float32(n)
    var = jnp.maximum(ssq / jnp.float32(n) - mean * mean, 0.0)   # biased var
    scale = jax.lax.rsqrt(var + _BN_EPS)        # gamma = 1
    shift = -mean * scale                       # beta  = 0

    # ---------------- pass 2: BN + ReLU + linear2 + normalize + logits ----------------
    cost2 = pl.CostEstimate(
        flops=2 * n_pad * (h_p * dout_p + dout_p * p_p) + 6 * n_pad * h_p,
        transcendentals=n_pad,
        bytes_accessed=(n_pad * h_p * h_bytes
                        + w2_p.size * w2_p.dtype.itemsize
                        + wptn.size * wptn.dtype.itemsize
                        + n_pad * (dout_p + p_p) * out_bytes),
    )
    z_pad, logits_pad = pl.pallas_call(
        functools.partial(_apply_kernel, mxu_dtype=mxu_dtype),
        out_shape=(
            jax.ShapeDtypeStruct((n_pad, dout_p), out_dtype),
            jax.ShapeDtypeStruct((n_pad, p_p), out_dtype),
        ),
        grid_spec=pltpu.PrefetchScalarGridSpec(
            num_scalar_prefetch=0,
            grid=(n_tiles,),
            in_specs=[
                pl.BlockSpec((tm, h_p), lambda i: (i, 0)),       # h: tiled
                _resident((1, h_p), lambda i: (0, 0)),           # BN scale
                _resident((1, h_p), lambda i: (0, 0)),           # BN shift
                _resident((h_p, dout_p), lambda i: (0, 0)),      # w2
                _resident((1, dout_p), lambda i: (0, 0)),        # b2
                _resident((dout_p, p_p), lambda i: (0, 0)),      # normalized wp^T
            ],
            out_specs=(
                pl.BlockSpec((tm, dout_p), lambda i: (i, 0)),
                pl.BlockSpec((tm, p_p), lambda i: (i, 0)),
            ),
        ),
        compiler_params=pltpu.CompilerParams(
            # Independent batch tiles -> megacore-shardable on v7x.
            dimension_semantics=("parallel",),
            vmem_limit_bytes=vmem_limit),
        cost_estimate=cost2,
    )(h_hbm, scale, shift, w2_p, b2_p, wptn)

    return z_pad[:n, :dout], logits_pad[:n, :p]


# --------------------------------------------------------------------------- #
if __name__ == "__main__":
    def reference(x, w1, b1, w2, b2, wp):
        h = x @ w1 + b1
        mu = h.mean(0, keepdims=True)
        var = ((h - mu) ** 2).mean(0, keepdims=True)
        h = jnp.maximum((h - mu) / jnp.sqrt(var + _BN_EPS), 0.0)
        z = h @ w2 + b2
        z = z / jnp.maximum(jnp.linalg.norm(z, axis=1, keepdims=True), 1e-12)
        wn = wp / jnp.maximum(jnp.linalg.norm(wp, axis=1, keepdims=True), 1e-12)
        return z, z @ wn.T

    def make_inputs(key, batch, din, hdim, dout, p):
        ks = jax.random.split(key, 6)
        x = jax.random.normal(ks[0], (batch, din), dtype=jnp.float32)
        w1 = jax.random.normal(ks[1], (din, hdim), dtype=jnp.float32) * 0.05
        b1 = jax.random.normal(ks[2], (hdim,), dtype=jnp.float32) * 0.01
        w2 = jax.random.normal(ks[3], (hdim, dout), dtype=jnp.float32) * 0.05
        b2 = jax.random.normal(ks[4], (dout,), dtype=jnp.float32) * 0.01
        wp = jax.random.normal(ks[5], (p, dout), dtype=jnp.float32) * 0.05
        return x, w1, b1, w2, b2, wp

    key = jax.random.PRNGKey(0)
    k1, k2 = jax.random.split(key)

    configs = [
        # (key, batch, input_dim, hidden_dim, output_dim, nmb_prototypes)
        (k1, 8, 32, 64, 16, 24),     # single tile, no padded batch rows
        (k2, 50, 96, 160, 48, 300),  # multi-tile (2-way core split), padded rows
    ]

    for kk, batch, din, hdim, dout, p in configs:
        args = make_inputs(kk, batch, din, hdim, dout, p)
        z_ref, lg_ref = reference(*args)

        # Exact path (f32 MXU inputs, f32 staging) — tight tolerance.
        z32, lg32 = swav_neck(*args, mxu_dtype=jnp.float32)
        jax.block_until_ready((z32, lg32))
        assert z32.shape == (batch, dout) and lg32.shape == (batch, p)
        assert jnp.allclose(z32, z_ref, atol=1e-4), "z mismatch (f32 path)"
        assert jnp.allclose(lg32, lg_ref, atol=1e-4), "logits mismatch (f32 path)"

        # bf16 MXU fast path (bf16 h staging, f32 accumulation) — loose tolerance.
        zbf, lgbf = swav_neck(*args, mxu_dtype=jnp.bfloat16)
        jax.block_until_ready((zbf, lgbf))
        assert zbf.shape == (batch, dout) and lgbf.shape == (batch, p)
        assert jnp.allclose(zbf, z_ref, atol=5e-2), "z mismatch (bf16 path)"
        assert jnp.allclose(lgbf, lg_ref, atol=5e-2), "logits mismatch (bf16 path)"

    print("KERNEL_OK")
</pallas_src>

<mosaic_0001>
module attributes {stable_mosaic.version = 11 : i64} {
  func.func @_stats_kernel(%arg0: i32, %arg1: i32, %arg2: memref<8x128xf32, #tpu.memory_space<vmem>>, %arg3: memref<128x128xf32, #tpu.memory_space<vmem>>, %arg4: memref<1x128xf32, #tpu.memory_space<vmem>>, %arg5: memref<8x128xf32, #tpu.memory_space<vmem>>, %arg6: memref<1x128xf32, #tpu.memory_space<vmem>>, %arg7: memref<1x128xf32, #tpu.memory_space<vmem>>) attributes {dimension_semantics = [#tpu.dimension_semantics<parallel>, #tpu.dimension_semantics<arbitrary>], iteration_bounds = array<i64: 1, 1>, scalar_prefetch = 0 : i64, scratch_operands = 0 : i64, tpu.core_type = #tpu.core_type<tc>, window_params = [{transform_indices = @transform_0, window_bounds = array<i64: 8, 128>}, {pipeline_mode = #tpu.pipeline_mode<synchronous>, transform_indices = @transform_1, window_bounds = array<i64: 128, 128>}, {pipeline_mode = #tpu.pipeline_mode<synchronous>, transform_indices = @transform_2, window_bounds = array<i64: 1, 128>}, {transform_indices = @transform_3, window_bounds = array<i64: 8, 128>}, {transform_indices = @transform_4, window_bounds = array<i64: 1, 128>}, {transform_indices = @transform_5, window_bounds = array<i64: 1, 128>}]} {
    %c0_i32 = arith.constant 0 : i32
    %0 = arith.cmpi eq, %arg1, %c0_i32 : i32
    %1 = arith.extui %0 : i1 to i32
    %c0_i32_0 = arith.constant 0 : i32
    %2 = arith.cmpi ne, %1, %c0_i32_0 : i32
    scf.if %2 {
      %cst_18 = arith.constant 0.000000e+00 : f32
      %21 = vector.broadcast %cst_18 : f32 to vector<1x128xf32>
      %c0_19 = arith.constant 0 : index
      %c0_20 = arith.constant 0 : index
      %22 = vector.load %arg6[%c0_19, %c0_20] : memref<1x128xf32, #tpu.memory_space<vmem>>, vector<1x128xf32>
      tpu.vector_store %arg6[%c0_19, %c0_20], %21 {strides = array<i32>} : memref<1x128xf32, #tpu.memory_space<vmem>>, vector<1x128xf32>,
      %cst_21 = arith.constant 0.000000e+00 : f32
      %23 = vector.broadcast %cst_21 : f32 to vector<1x128xf32>
      %c0_22 = arith.constant 0 : index
      %c0_23 = arith.constant 0 : index
      %24 = vector.load %arg7[%c0_22, %c0_23] : memref<1x128xf32, #tpu.memory_space<vmem>>, vector<1x128xf32>
      tpu.vector_store %arg7[%c0_22, %c0_23], %23 {strides = array<i32>} : memref<1x128xf32, #tpu.memory_space<vmem>>, vector<1x128xf32>,
    } else {
    }
    %c0 = arith.constant 0 : index
    %c0_1 = arith.constant 0 : index
    %3 = vector.load %arg2[%c0, %c0_1] : memref<8x128xf32, #tpu.memory_space<vmem>>, vector<8x128xf32>
    %c0_2 = arith.constant 0 : index
    %c0_3 = arith.constant 0 : index
    %4 = vector.load %arg3[%c0_2, %c0_3] : memref<128x128xf32, #tpu.memory_space<vmem>>, vector<128x128xf32>
    %cst = arith.constant dense<0.000000e+00> : vector<8x128xf32>
    %5 = tpu.matmul %3, %4, %cst {dimension_numbers = #tpu.dot_dimension_numbers<[1], [0], [0], [1], [0, 0, 1, 1], [], []>} : vector<8x128xf32>, vector<128x128xf32>, vector<8x128xf32> -> vector<8x128xf32>
    %c0_4 = arith.constant 0 : index
    %c0_5 = arith.constant 0 : index
    %6 = vector.load %arg4[%c0_4, %c0_5] : memref<1x128xf32, #tpu.memory_space<vmem>>, vector<1x128xf32>
    %7 = vector.broadcast %6 : vector<1x128xf32> to vector<8x128xf32>
    %8 = arith.addf %5, %7 : vector<8x128xf32>
    %c0_6 = arith.constant 0 : index
    %c0_7 = arith.constant 0 : index
    %9 = vector.load %arg5[%c0_6, %c0_7] : memref<8x128xf32, #tpu.memory_space<vmem>>, vector<8x128xf32>
    tpu.vector_store %arg5[%c0_6, %c0_7], %8 {strides = array<i32>} : memref<8x128xf32, #tpu.memory_space<vmem>>, vector<8x128xf32>,
    %c0_8 = arith.constant 0 : index
    %c0_9 = arith.constant 0 : index
    %10 = vector.load %arg6[%c0_8, %c0_9] : memref<1x128xf32, #tpu.memory_space<vmem>>, vector<1x128xf32>
    %cst_10 = arith.constant dense<0.000000e+00> : vector<128xf32>
    %11 = vector.multi_reduction <add>, %8, %cst_10 [0] : vector<8x128xf32> to vector<128xf32>
    %12 = vector.shape_cast %11 : vector<128xf32> to vector<1x128xf32>
    %13 = arith.addf %10, %12 : vector<1x128xf32>
    %c0_11 = arith.constant 0 : index
    %c0_12 = arith.constant 0 : index
    %14 = vector.load %arg6[%c0_11, %c0_12] : memref<1x128xf32, #tpu.memory_space<vmem>>, vector<1x128xf32>
    tpu.vector_store %arg6[%c0_11, %c0_12], %13 {strides = array<i32>} : memref<1x128xf32, #tpu.memory_space<vmem>>, vector<1x128xf32>,
    %c0_13 = arith.constant 0 : index
    %c0_14 = arith.constant 0 : index
    %15 = vector.load %arg7[%c0_13, %c0_14] : memref<1x128xf32, #tpu.memory_space<vmem>>, vector<1x128xf32>
    %16 = arith.mulf %8, %8 : vector<8x128xf32>
    %cst_15 = arith.constant dense<0.000000e+00> : vector<128xf32>
    %17 = vector.multi_reduction <add>, %16, %cst_15 [0] : vector<8x128xf32> to vector<128xf32>
    %18 = vector.shape_cast %17 : vector<128xf32> to vector<1x128xf32>
    %19 = arith.addf %15, %18 : vector<1x128xf32>
    %c0_16 = arith.constant 0 : index
    %c0_17 = arith.constant 0 : index
    %20 = vector.load %arg7[%c0_16, %c0_17] : memref<1x128xf32, #tpu.memory_space<vmem>>, vector<1x128xf32>
    tpu.vector_store %arg7[%c0_16, %c0_17], %19 {strides = array<i32>} : memref<1x128xf32, #tpu.memory_space<vmem>>, vector<1x128xf32>,
    return
  }
  func.func @transform_0(%arg0: i32, %arg1: i32) -> (i32, i32) {
    %c1_i32 = arith.constant 1 : i32
    %0 = arith.muli %arg0, %c1_i32 : i32
    %1 = arith.addi %0, %arg1 : i32
    %c0_i32 = arith.constant 0 : i32
    %c0_i32_0 = arith.constant 0 : i32
    return %1, %c0_i32 : i32, i32
  }
  func.func @transform_1(%arg0: i32, %arg1: i32) -> (i32, i32) {
    %c0_i32 = arith.constant 0 : i32
    %c0_i32_0 = arith.constant 0 : i32
    %c0_i32_1 = arith.constant 0 : i32
    return %c0_i32, %c0_i32_0 : i32, i32
  }
  func.func @transform_2(%arg0: i32, %arg1: i32) -> (i32, i32) {
    %c0_i32 = arith.constant 0 : i32
    %c0_i32_0 = arith.constant 0 : i32
    %c0_i32_1 = arith.constant 0 : i32
    return %c0_i32, %c0_i32_0 : i32, i32
  }
  func.func @transform_3(%arg0: i32, %arg1: i32) -> (i32, i32) {
    %c1_i32 = arith.constant 1 : i32
    %0 = arith.muli %arg0, %c1_i32 : i32
    %1 = arith.addi %0, %arg1 : i32
    %c0_i32 = arith.constant 0 : i32
    %c0_i32_0 = arith.constant 0 : i32
    return %1, %c0_i32 : i32, i32
  }
  func.func @transform_4(%arg0: i32, %arg1: i32) -> (i32, i32) {
    %c0_i32 = arith.constant 0 : i32
    %c0_i32_0 = arith.constant 0 : i32
    return %arg0, %c0_i32 : i32, i32
  }
  func.func @transform_5(%arg0: i32, %arg1: i32) -> (i32, i32) {
    %c0_i32 = arith.constant 0 : i32
    %c0_i32_0 = arith.constant 0 : i32
    return %arg0, %c0_i32 : i32, i32
  }
}

</mosaic_0001>

<bundles_post_ra>
// kernel: tpu_custom_call.1
= control target key start
LH: loop header
LB: loop body
LE: loop exit
PB: predicated region body
PF: predicated region fallthrough
CT: control target
= control target key end

     0   :  { %11 = vsyncpa [#allocation3], 0  ;;  %s539_s0 = inlined_call_operand.hbm [shape: f32[8,128], index: 0, kind: input, shape index: {}]   ;;  %s540_s1 = inlined_call_operand.hbm [shape: f32[128,128], index: 1, kind: input, shape index: {}]   ;;  %s541_s2 = inlined_call_operand.vmem [shape: f32[1,128], index: 2, kind: input, shape index: {}]   ;;  %s542_s3 = inlined_call_operand.hbm [shape: f32[8,128], index: 3, kind: output, shape index: {0}]   ;;  %s543_s4 = inlined_call_operand.hbm [shape: f32[1,128], index: 4, kind: output, shape index: {1}]   ;;  %s544_s5 = inlined_call_operand.hbm [shape: f32[1,128], index: 5, kind: output, shape index: {2}]  }
   0x1   :  { %12 = vsyncpa [#allocation6], 0 }
   0x2   :  { %13 = vsyncpa [#allocation4], 0 }
   0x3   :  { %14 = vsyncpa [#allocation9], 0  ;;  %s421_s18 = smov [#allocation2]   ;;  %s422_s20 = smov [#allocation5]  }
   0x4   :  { %s24_s19 = sshll.u32 %s421_s18, 4  ;;  %s33_s21 = sshll.u32 %s422_s20, 4  ;;  %s25_s19 = int_to_ptr.vmem [resolvable:$true] %s24_s19  ;;  %s461_s21 = int_to_ptr.vmem [resolvable:$true] %s33_s21 }
   0x5   :  { %s303_s24 = scalar_lea.hbm %s539_s0, 128 }
   0x6   :  { %p304_p0 = scmp.ne.s32.totalorder %s539_s0, %s303_s24  ;;  %p307_p1 = scmp.lt.u32.totalorder %s303_s24, %s539_s0 }
   0x8   :  { %p309_p2 = pnand %p307_p1, %p304_p0 }
   0xa   :  { %312 = shalt.err (!%p309_p2)
}
   0xb   :  { %s313_s29 = scalar_lea.vmem %s25_s19, 128  ;;  %p318_p4 = scmp.lt.s32.totalorder %s25_s19, %s25_s19 }
   0xc   :  { %p314_p3 = scmp.ne.s32.totalorder %s25_s19, %s313_s29  ;;  %p319_p5 = scmp.lt.s32.totalorder %s313_s29, %s313_s29 }
   0xe   :  { %p320_p6 = por %p319_p5, %p318_p4 }
  0x10   :  { %p321_p7 = pnand %p320_p6, %p314_p3 }
  0x12   :  { %324 = shalt.err (!%p321_p7)
}
  0x13   :  { %27 = dma.hbm_to_vmem [thread:$0]  %s539_s0, 128, %s25_s19, [#allocation3]  }
  0x14   :  { %s325_s9 = scalar_lea.hbm %s540_s1, 2048 }
  0x15   :  { %p326_p8 = scmp.ne.s32.totalorder %s540_s1, %s325_s9  ;;  %p329_p9 = scmp.lt.u32.totalorder %s325_s9, %s540_s1 }
  0x17   :  { %p331_p10 = pnand %p329_p9, %p326_p8 }
  0x19   :  { %334 = shalt.err (!%p331_p10)
}
  0x1a   :  { %s335_s14 = scalar_lea.vmem %s461_s21, 2048  ;;  %p340_p12 = scmp.lt.s32.totalorder %s461_s21, %s461_s21 }
  0x1b   :  { %p336_p11 = scmp.ne.s32.totalorder %s461_s21, %s335_s14  ;;  %p341_p13 = scmp.lt.s32.totalorder %s335_s14, %s335_s14 }
  0x1d   :  { %p342_p0 = por %p341_p13, %p340_p12 }
  0x1f   :  { %p343_p1 = pnand %p342_p0, %p336_p11 }
  0x21   :  { %346 = shalt.err (!%p343_p1)
}
  0x22   :  { %s423_s0 = smov 128   ;;  %s424_s15 = smov 8  }
  0x23   :  { %39 = dma.hbm_to_vmem [thread:$0]  %s540_s1, 2048, %s461_s21, [#allocation6], %s423_s0, %s423_s0, %s424_s15  }
  0x24   :  { %413 = dma.done.wait [#allocation3], 128  }
  0x25   :  { %414 = vsyncadd [#allocation3], 4294967168 }
  0x26   :  { %415 = dma.done.wait [#allocation6], 2048  }
  0x27   :  { %416 = vsyncadd [#allocation6], 4294965248  ;;  %v425_v0 = vmov 0.0|0.0   ;;  %v426_v1 = vmov 0.0   ;;  %vm427_vm0 = vmmov 0   ;;  %v57_v2 = vld [vmem:[#allocation5] sm:$0xff] }
  0x28   :  { %269 = vmatprep.subr.bf16.mxu0 %v425_v0  ;;  %54 = vst [vmem:[#allocation8] sm:$0x1] %v426_v1  ;;  %55 = vst [vmem:[#allocation10] sm:$0x1] %v426_v1  ;;  %266 = vmatprep.mubr.msk.f32.mxu0 %vm427_vm0, %v426_v1  ;;  %v58_v3 = vld [vmem:[#allocation5 + $0x8] sm:$0xff]  ;;  %v59_v4 = vld [vmem:[#allocation5 + $0x10] sm:$0xff] }
  0x29   :  { %v270_v5 = vpack.c.bf16 %v58_v3, %v57_v2  ;;  %v60_v6 = vld [vmem:[#allocation5 + $0x18] sm:$0xff]  ;;  %v61_v8 = vld [vmem:[#allocation5 + $0x20] sm:$0xff]  ;;  %v62_v9 = vld [vmem:[#allocation5 + $0x28] sm:$0xff]  ;;  %s428_s19 = smov [#allocation7]  }
  0x2a   :  { %v273_v7 = vpack.c.bf16 %v60_v6, %v59_v4  ;;  %v276_v10 = vpack.c.bf16 %v62_v9, %v61_v8  ;;  %v63_v11 = vld [vmem:[#allocation5 + $0x30] sm:$0xff]  ;;  %v64_v12 = vld [vmem:[#allocation5 + $0x38] sm:$0xff]  ;;  %v65_v14 = vld [vmem:[#allocation5 + $0x40] sm:$0xff]  ;;  %s179_s20 = sshll.u32 %s428_s19, 4  ;;  %s180_s20 = int_to_ptr.vmem [resolvable:$true] %s179_s20 }
  0x2b   :  { %271 = vmatpush3.bf16.msra.mxu0 %v270_v5  ;;  %v279_v13 = vpack.c.bf16 %v64_v12, %v63_v11  ;;  %v66_v15 = vld [vmem:[#allocation5 + $0x48] sm:$0xff]  ;;  %v67_v17 = vld [vmem:[#allocation5 + $0x50] sm:$0xff]  ;;  %v68_v18 = vld [vmem:[#allocation5 + $0x58] sm:$0xff]  ;;  %s347_s21 = scalar_lea.vmem %s180_s20, 128  ;;  %p352_p3 = scmp.lt.s32.totalorder %s180_s20, %s180_s20 }
  0x2c   :  { %272 = vmatprep.subr.bf16.mxu0 %v425_v0  ;;  %v282_v16 = vpack.c.bf16 %v66_v15, %v65_v14  ;;  %v285_v19 = vpack.c.bf16 %v68_v18, %v67_v17  ;;  %v69_v20 = vld [vmem:[#allocation5 + $0x60] sm:$0xff]  ;;  %v70_v21 = vld [vmem:[#allocation5 + $0x68] sm:$0xff]  ;;  %v71_v23 = vld [vmem:[#allocation5 + $0x70] sm:$0xff]  ;;  %p348_p2 = scmp.ne.s32.totalorder %s180_s20, %s347_s21  ;;  %p353_p4 = scmp.lt.s32.totalorder %s347_s21, %s347_s21 }
  0x2d   :  { %v288_v22 = vpack.c.bf16 %v70_v21, %v69_v20  ;;  %v72_v24 = vld [vmem:[#allocation5 + $0x78] sm:$0xff] }
  0x2e   :  { %v291_v25 = vpack.c.bf16 %v72_v24, %v71_v23  ;;  %v56_v26 = vld [vmem:[#allocation2] sm:$0xff]  ;;  %p354_p5 = por %p353_p4, %p352_p3 }
  0x2f   :  { %274 = vmatpush3.bf16.msra.mxu0 %v273_v7  ;;  %v216_v27 = vld [vmem:[%s541_s2] ss:$0 sm:$0xff] }
  0x30   :  { %275 = vmatprep.subr.bf16.mxu0 %v425_v0  ;;  %p355_p6 = pnand %p354_p5, %p348_p2 }
  0x33   :  { %277 = vmatpush3.bf16.msra.mxu0 %v276_v10 }
  0x34   :  { %278 = vmatprep.subr.bf16.mxu0 %v425_v0 }
  0x37   :  { %280 = vmatpush3.bf16.msra.mxu0 %v279_v13 }
  0x38   :  { %281 = vmatprep.subr.bf16.mxu0 %v425_v0 }
  0x3b   :  { %283 = vmatpush3.bf16.msra.mxu0 %v282_v16 }
  0x3c   :  { %284 = vmatprep.subr.bf16.mxu0 %v425_v0 }
  0x3f   :  { %286 = vmatpush3.bf16.msra.mxu0 %v285_v19 }
  0x40   :  { %287 = vmatprep.subr.bf16.mxu0 %v425_v0 }
  0x43   :  { %289 = vmatpush3.bf16.msra.mxu0 %v288_v22 }
  0x44   :  { %290 = vmatprep.subr.bf16.mxu0 %v425_v0 }
  0x47   :  { %292 = vmatpush3.bf16.msra.mxu0 %v291_v25 }
  0x4a   :  { %267 = vmatmul.mubr.f32.vlgmr.msra.gmra.mrb[0].mxu0 %v56_v26 }
 0x11d   :  { %v146_v28 = vpop.f32.mrb[0].mxu0 }
 0x11e   :  { %v147_v29 = vadd.f32 %v216_v27, %v146_v28  ;;  %v268_v30 = vpop.f32.mrb[1].mxu0 }
 0x120   :  { %v152_v31 = vrot.slane %v147_v29, 4  ;;  %v161_v32 = vmul.f32 %v147_v29, %v147_v29  ;;  %150 = vst [vmem:[#allocation7] sm:$0xff] %v147_v29 }
 0x121   :  { %358 = shalt.err (!%p355_p6)
}
 0x122   :  { %s359_s2 = scalar_lea.hbm %s542_s3, 128 }
 0x123   :  { %p360_p7 = scmp.ne.s32.totalorder %s542_s3, %s359_s2  ;;  %p363_p8 = scmp.lt.u32.totalorder %s359_s2, %s542_s3 }
 0x125   :  { %p365_p9 = pnand %p363_p8, %p360_p7 }
 0x127   :  { %368 = shalt.err (!%p365_p9)
}
 0x128   :  { %182 = dma.vmem_to_hbm [thread:$0]  %s180_s20, 128, %s542_s3, [#allocation4]   ;;  %v153_v33 = vadd.f32 %v152_v31, %v147_v29  ;;  %v162_v34 = vrot.slane %v161_v32, 4  ;;  %v151_v41 = vld [vmem:[#allocation8] sm:$0x1] }
 0x129   :  { %s429_s30 = smov [#allocation8]   ;;  %v160_v44 = vld [vmem:[#allocation10] sm:$0x1]  ;;  %s430_s7 = smov [#allocation10]  }
 0x12a   :  { %v154_v35 = vrot.slane %v153_v33, 2  ;;  %v163_v36 = vadd.f32 %v162_v34, %v161_v32  ;;  %s189_s6 = sshll.u32 %s429_s30, 4  ;;  %s199_s8 = sshll.u32 %s430_s7, 4  ;;  %s190_s6 = int_to_ptr.vmem [resolvable:$true] %s189_s6  ;;  %s507_s8 = int_to_ptr.vmem [resolvable:$true] %s199_s8 }
 0x12b   :  { %s369_s3 = scalar_lea.vmem %s190_s6, 16  ;;  %s373_s9 = scalar_lea.vmem %s190_s6, 32 }
 0x12c   :  { %v155_v37 = vadd.f32 %v154_v35, %v153_v33  ;;  %v164_v38 = vrot.slane %v163_v36, 2  ;;  %p370_p10 = scmp.ne.s32.totalorder %s190_s6, %s369_s3  ;;  %p374_p11 = scmp.lt.s32.totalorder %s190_s6, %s190_s6 }
 0x12d   :  { %p375_p12 = scmp.lt.s32.totalorder %s373_s9, %s369_s3 }
 0x12e   :  { %v156_v39 = vrot.slane %v155_v37, 1  ;;  %v165_v40 = vadd.f32 %v164_v38, %v163_v36 }
 0x12f   :  { %p376_p13 = por %p375_p12, %p374_p11 }
 0x130   :  { %v157_v42 = vadd.f32 %v156_v39, %v155_v37  ;;  %v166_v43 = vrot.slane %v165_v40, 1 }
 0x131   :  { %p377_p0 = pnand %p376_p13, %p370_p10 }
 0x132   :  { %v158_v45 = vadd.f32 %v157_v42, %v151_v41  ;;  %v167_v46 = vadd.f32 %v166_v43, %v165_v40 }
 0x134   :  { %159 = vst [vmem:[#allocation8] sm:$0x1] %v158_v45  ;;  %v168_v47 = vadd.f32 %v167_v46, %v160_v44 }
 0x135   :  { %380 = shalt.err (!%p377_p0)
}
 0x136   :  { %s381_s12 = scalar_lea.hbm %s543_s4, 16 }
 0x137   :  { %p382_p1 = scmp.ne.s32.totalorder %s543_s4, %s381_s12  ;;  %p385_p2 = scmp.lt.u32.totalorder %s381_s12, %s543_s4 }
 0x139   :  { %p387_p3 = pnand %p385_p2, %p382_p1 }
 0x13b   :  { %390 = shalt.err (!%p387_p3)
}
 0x13c   :  { %192 = dma.vmem_to_hbm [thread:$0]  %s190_s6, 16, %s543_s4, [#allocation9]   ;;  %169 = vst [vmem:[#allocation10] sm:$0x1] %v168_v47 }
 0x13d   :  { %s391_s1 = scalar_lea.vmem %s507_s8, 16  ;;  %s395_s18 = scalar_lea.vmem %s507_s8, 32 }
 0x13e   :  { %p392_p4 = scmp.ne.s32.totalorder %s507_s8, %s391_s1  ;;  %p396_p5 = scmp.lt.s32.totalorder %s507_s8, %s507_s8 }
 0x13f   :  { %p397_p6 = scmp.lt.s32.totalorder %s395_s18, %s391_s1 }
 0x141   :  { %p398_p7 = por %p397_p6, %p396_p5 }
 0x143   :  { %p399_p8 = pnand %p398_p7, %p392_p4 }
 0x145   :  { %402 = shalt.err (!%p399_p8)
}
 0x146   :  { %s403_s21 = scalar_lea.hbm %s544_s5, 16 }
 0x147   :  { %p404_p9 = scmp.ne.s32.totalorder %s544_s5, %s403_s21  ;;  %p407_p10 = scmp.lt.u32.totalorder %s403_s21, %s544_s5 }
 0x149   :  { %p409_p11 = pnand %p407_p10, %p404_p9 }
 0x14b   :  { %412 = shalt.err (!%p409_p11)
}
 0x14c   :  { %202 = dma.vmem_to_hbm [thread:$0]  %s507_s8, 16, %s544_s5, [#allocation9]  }
 0x14d   :  { %417 = dma.done.wait [#allocation4], 128  }
 0x14e   :  { %418 = vsyncadd [#allocation4], 4294967168 }
 0x14f   :  { %419 = dma.done.wait [#allocation9], 32  }
 0x150   :  { %420 = vsyncadd [#allocation9], 4294967264 }
 0x151   :  { %212 = vsyncpa [#allocation3], 1 }
 0x152   :  { %213 = vsyncpa [#allocation6], 1 }
 0x153   :  { %214 = vsyncpa [#allocation4], 1 }
 0x154   :  { %215 = vsyncpa [#allocation9], 1 }

</bundles_post_ra>
